<compile_context>
chip_gen: v7x
topology: tpu7x:2x2x1
jax: 0.10.0
libtpu: 0.0.40
codegen_flags: <defaults>
</compile_context>

<pallas_src>
from functools import partial  # noqa: F401
from itertools import permutations

import numpy as np
import jax
import jax.numpy as jnp
from jax.experimental import pallas as pl
from jax.experimental.pallas import tpu as pltpu


# ----------------------------------------------------------------------------
# Pallas kernel 1: elementwise thresholding  (prob_to_binary)
# ----------------------------------------------------------------------------
def _threshold_kernel(thr_ref, x_ref, o_ref):
    # thr_ref lives in SMEM: scalar read on the scalar unit, off the VPU path.
    o_ref[...] = (x_ref[...] >= thr_ref[0]).astype(jnp.int8)


_THRESHOLD_CACHE = {}
# Tile budget (double-buffered): 2 * (256*2048*4B in + 256*2048*1B out) ~= 5 MiB
# -> safely under the scoped-VMEM defaults on v5e (16 MiB), v6e (32 MiB), v7x (32 MiB).
_BB_PREF = 256    # sublane tile (multiple of 8 and of 32 for the int8 output)
_BT_PREF = 2048   # lane tile (multiple of 128)


def prob_to_binary_pallas(x, threshold):
    """x: (B, T) float -> (B, T) int8 binary mask (x >= threshold)."""
    x = jnp.asarray(x, jnp.float32)
    B, T = x.shape
    bb = B if B <= _BB_PREF else _BB_PREF   # full dim or aligned tile
    bt = T if T <= _BT_PREF else _BT_PREF
    key = (B, T, bb, bt)
    fn = _THRESHOLD_CACHE.get(key)
    if fn is None:
        fn = pl.pallas_call(
            _threshold_kernel,
            out_shape=jax.ShapeDtypeStruct((B, T), jnp.int8),
            grid=(pl.cdiv(B, bb), pl.cdiv(T, bt)),
            in_specs=[
                pl.BlockSpec(memory_space=pltpu.MemorySpace.SMEM),  # threshold scalar
                pl.BlockSpec((bb, bt), lambda i, j: (i, j)),
            ],
            out_specs=pl.BlockSpec((bb, bt), lambda i, j: (i, j)),
            compiler_params=pltpu.CompilerParams(
                dimension_semantics=("parallel", "parallel"),
                vmem_limit_bytes=64 * 1024 * 1024,
            ),
        )
        _THRESHOLD_CACHE[key] = fn
    thr = jnp.asarray([threshold], jnp.float32)
    return fn(thr, x)


# ----------------------------------------------------------------------------
# Pallas kernel 2: batched pairwise interval IoU  (jaccard_overlap)
#   out events : (n, A_pad, 2)  rows = [start, end), zero-padded
#   tgt events : (n, 2, B_pad)  row0 = starts, row1 = ends, zero-padded
#   result     : (n, A_pad, B_pad) f32, zeros in padded region (no NaNs)
# ----------------------------------------------------------------------------
def _iou_batched_kernel(out_ref, tgt_ref, o_ref):
    out_start = out_ref[0, :, 0:1]      # (A_pad, 1)
    out_end = out_ref[0, :, 1:2]        # (A_pad, 1)
    tgt_start = tgt_ref[0, 0:1, :]      # (1, B_pad)
    tgt_end = tgt_ref[0, 1:2, :]        # (1, B_pad)

    max_min = jnp.maximum(out_start, tgt_start)            # (A_pad, B_pad)
    min_max = jnp.minimum(out_end, tgt_end)
    inter = jnp.maximum(min_max - max_min, 0.0)
    denom = (out_end - out_start) + (tgt_end - tgt_start) - inter

    valid = denom > 0.0
    denom_safe = jnp.where(valid, denom, 1.0)
    # EUP reciprocal (free slot) + one Newton step -> ~f32-accurate division.
    r = pl.reciprocal(denom_safe, approx=True)
    r = r * (2.0 - denom_safe * r)
    o_ref[0, :, :] = jnp.where(valid, inter * r, 0.0)


_IOU_CACHE = {}


def _next_pow2(n):
    p = 1
    while p < n:
        p *= 2
    return p


def _get_iou_call(n, a_pad, b_pad):
    key = (n, a_pad, b_pad)
    fn = _IOU_CACHE.get(key)
    if fn is None:
        fn = pl.pallas_call(
            _iou_batched_kernel,
            out_shape=jax.ShapeDtypeStruct((n, a_pad, b_pad), jnp.float32),
            grid=(n,),
            in_specs=[
                pl.BlockSpec((1, a_pad, 2), lambda b: (b, 0, 0)),
                pl.BlockSpec((1, 2, b_pad), lambda b: (b, 0, 0)),
            ],
            out_specs=pl.BlockSpec((1, a_pad, b_pad), lambda b: (b, 0, 0)),
            compiler_params=pltpu.CompilerParams(
                dimension_semantics=("parallel",),
            ),
        )
        _IOU_CACHE[key] = fn
    return fn


def jaccard_overlap_batched_pallas(output_events, target_events):
    """output_events / target_events: lists of (Ai, 2) / (Bi, 2) int arrays.

    Returns a list of (Ai, Bi) float32 numpy IoU matrices, computed in a single
    Pallas launch with bucketed, fixed pad shapes (cached executable).
    """
    n = len(output_events)
    if n == 0:
        return []
    a_max = max(int(ev.shape[0]) for ev in output_events)
    b_max = max(int(ev.shape[0]) for ev in target_events)
    a_pad = max(8, 8 * _next_pow2((a_max + 7) // 8))
    b_pad = max(128, 128 * _next_pow2((b_max + 127) // 128))
    n_pad = _next_pow2(n)

    out_pad = np.zeros((n_pad, a_pad, 2), dtype=np.float32)
    tgt_pad = np.zeros((n_pad, 2, b_pad), dtype=np.float32)
    for i, (oev, tev) in enumerate(zip(output_events, target_events)):
        out_pad[i, : oev.shape[0], :] = np.asarray(oev, dtype=np.float32)
        tgt_pad[i, :, : tev.shape[0]] = np.asarray(tev, dtype=np.float32).T

    fn = _get_iou_call(n_pad, a_pad, b_pad)
    iou_pad = np.asarray(jax.device_get(fn(jnp.asarray(out_pad), jnp.asarray(tgt_pad))))
    return [
        iou_pad[i, : output_events[i].shape[0], : target_events[i].shape[0]]
        for i in range(n)
    ]


# ----------------------------------------------------------------------------
# Host-side glue (data-dependent shapes -> not Pallas-friendly)
# ----------------------------------------------------------------------------
def binary_to_array(x):
    """[0,0,1,1,0,1] -> [[start, end), ...] (same as the torch version)."""
    tmp = np.concatenate([[0], np.asarray(x), [0]])
    return np.where(tmp[1:] - tmp[:-1] != 0)[0].reshape((-1, 2))


def ProcessingPostEvent(seq, predicted_events, len_threshold):
    for b, events in enumerate(predicted_events):
        if events.shape[0] == 0:
            continue
        idx = np.where(events[:, 1] - events[:, 0] < len_threshold)[0]
        for ev in events[idx]:
            seq[b][ev[0]:ev[1]] = 0


# TODO(synk): scipy.optimize.linear_sum_assignment (Hungarian) has no Pallas
# equivalent; exact brute-force substitute for the tiny event counts used here
# (factorial in the number of events -- fine for <= ~8 events per item).
def linear_sum_assignment(cost):
    cost = np.asarray(cost, dtype=np.float64)
    A, B = cost.shape
    if A > B:
        c_ind, r_ind = linear_sum_assignment(cost.T)
        order = np.argsort(r_ind)
        return r_ind[order], c_ind[order]
    best_cols, best_cost = None, None
    rows = np.arange(A)
    for cols in permutations(range(B), A):
        c = cost[rows, list(cols)].sum()
        if best_cost is None or c < best_cost:
            best_cost, best_cols = c, cols
    return rows, np.array(best_cols)


class Event:
    def __init__(self, threshold, device=None, freq=100, time=0.5, test=False):
        self.threshold = threshold
        self.freq = freq
        self.time = time
        self.len_threshold = int(freq * time)
        self.test = test

    def get_event(self, seq, processingpost=None, prob=True):
        seq = np.array(seq, dtype=np.float32)   # writable host copy (mirrors in-place torch edit)
        assert seq.ndim == 2
        predicted_events = self._get_event_n(seq, prob)
        if processingpost is not None:
            processingpost(seq, predicted_events, self.len_threshold)
            predicted_events = self._get_event_n(seq, prob)
        return predicted_events

    def _get_event_n(self, seq, prob=True):
        if prob:
            binarized = np.asarray(jax.device_get(prob_to_binary_pallas(seq, self.threshold)))
            return [binary_to_array(k) for k in binarized]
        return [binary_to_array(k) for k in seq]


class By_Event_Bipartite:
    def __init__(self, threshold, IOU_threshold, device="tpu", **kwargs):
        self.threshold = threshold
        self.IOU_threshold = IOU_threshold
        self.get_event = Event(threshold, device, **kwargs)

    def jaccard_overlap(self, output_ev, target_ev):
        """Single-pair API (kept for compatibility); uses the batched kernel."""
        return jaccard_overlap_batched_pallas([np.asarray(output_ev)],
                                              [np.asarray(target_ev)])[0]

    def forward(self, output, target):
        TP = 0.0
        FN = 0.0
        FP = 0.0
        predicted_events_output = self.get_event.get_event(
            output, processingpost=ProcessingPostEvent, prob=True
        )
        predicted_events_target = self.get_event.get_event(target, prob=False)

        # Gather the items that actually need an IoU matrix; handle the
        # empty-event edge cases exactly like the torch forward.
        valid_idx, valid_out, valid_tgt = [], [], []
        for i in range(output.shape[0]):
            output_item = predicted_events_output[i]
            target_item = predicted_events_target[i]
            if target_item.shape[0] == 0:
                FN += output_item.shape[0]
                continue
            elif output_item.shape[0] == 0:
                FP += target_item.shape[0]
                continue
            valid_idx.append(i)
            valid_out.append(output_item)
            valid_tgt.append(target_item)

        # ONE batched Pallas launch + ONE device_get for all items (no per-item
        # dispatch / host sync inside the loop).
        ious = []
        if valid_idx:
            iou_mats = jaccard_overlap_batched_pallas(valid_out, valid_tgt)
            for iou_mat in iou_mats:
                iou = -1.0 * iou_mat
                ious.append(iou)
                indices = linear_sum_assignment(iou)
                print(indices)
        # PyTorch forward returns None; returning the IoU results so the caller
        # can block on the device computation.
        return ious


if __name__ == "__main__":
    key = jax.random.PRNGKey(0)
    B, T = 2, 128

    # low-probability noise + deterministic injected event spans
    noise = jax.random.uniform(key, (B, T), minval=0.0, maxval=0.3, dtype=jnp.float32)
    output = np.array(noise)
    output[0, 10:30] = 0.90
    output[0, 50:53] = 0.95   # short event -> removed by post-processing (len_threshold=5)
    output[0, 80:100] = 0.85
    output[1, 20:60] = 0.90
    output[1, 100:103] = 0.90  # short event -> removed

    target = np.zeros((B, T), dtype=np.float32)
    target[0, 12:32] = 1.0
    target[0, 78:98] = 1.0
    target[1, 25:65] = 1.0

    model = By_Event_Bipartite(threshold=0.5, IOU_threshold=0.3, freq=10, time=0.5)
    ious = model.forward(jnp.asarray(output), jnp.asarray(target))
    # Block on device work (the IoU matrices already came back via device_get;
    # also touch a fresh kernel result to be explicit).
    jax.block_until_ready(prob_to_binary_pallas(jnp.asarray(output), 0.5))
    print("KERNEL_OK")
</pallas_src>

<mosaic_0001>
module attributes {stable_mosaic.version = 11 : i64} {
  func.func @_threshold_kernel(%arg0: i32, %arg1: i32, %arg2: memref<1xf32, #tpu.memory_space<smem>>, %arg3: memref<2x128xf32, #tpu.memory_space<vmem>>, %arg4: memref<2x128xi8, #tpu.memory_space<vmem>>) attributes {dimension_semantics = [#tpu.dimension_semantics<parallel>, #tpu.dimension_semantics<parallel>], iteration_bounds = array<i64: 1, 1>, scalar_prefetch = 0 : i64, scratch_operands = 0 : i64, tpu.core_type = #tpu.core_type<tc>, window_params = [{transform_indices = @transform_0, window_bounds = array<i64: 1>}, {transform_indices = @transform_1, window_bounds = array<i64: 2, 128>}, {transform_indices = @transform_2, window_bounds = array<i64: 2, 128>}]} {
    %c0 = arith.constant 0 : index
    %c0_0 = arith.constant 0 : index
    %0 = vector.load %arg3[%c0, %c0_0] : memref<2x128xf32, #tpu.memory_space<vmem>>, vector<2x128xf32>
    %c0_1 = arith.constant 0 : index
    %1 = memref.load %arg2[%c0_1] : memref<1xf32, #tpu.memory_space<smem>>
    %2 = vector.broadcast %1 : f32 to vector<2x128xf32>
    %3 = arith.cmpf oge, %0, %2 : vector<2x128xf32>
    %4 = arith.extui %3 : vector<2x128xi1> to vector<2x128xi8>
    %c0_2 = arith.constant 0 : index
    %c0_3 = arith.constant 0 : index
    %5 = vector.load %arg4[%c0_2, %c0_3] : memref<2x128xi8, #tpu.memory_space<vmem>>, vector<2x128xi8>
    tpu.vector_store %arg4[%c0_2, %c0_3], %4 {strides = array<i32>} : memref<2x128xi8, #tpu.memory_space<vmem>>, vector<2x128xi8>,
    return
  }
  func.func @transform_0(%arg0: i32, %arg1: i32) -> i32 {
    %c0_i32 = arith.constant 0 : i32
    %c0_i32_0 = arith.constant 0 : i32
    return %c0_i32 : i32
  }
  func.func @transform_1(%arg0: i32, %arg1: i32) -> (i32, i32) {
    %c0_i32 = arith.constant 0 : i32
    return %arg0, %arg1 : i32, i32
  }
  func.func @transform_2(%arg0: i32, %arg1: i32) -> (i32, i32) {
    %c0_i32 = arith.constant 0 : i32
    return %arg0, %arg1 : i32, i32
  }
}

</mosaic_0001>

<bundles_post_ra>
// kernel: tpu_custom_call.1
= control target key start
LH: loop header
LB: loop body
LE: loop exit
PB: predicated region body
PF: predicated region fallthrough
CT: control target
= control target key end

     0   :  { %8 = vsyncpa [#allocation4], 0  ;;  %s151_s0 = inlined_call_operand.<no memory space> [shape: f32[1], index: 0, kind: input, shape index: {}]   ;;  %s152_s1 = inlined_call_operand.hbm [shape: f32[2,128], index: 1, kind: input, shape index: {}]   ;;  %s153_s2 = inlined_call_operand.hbm [shape: s8[2,128], index: 2, kind: output, shape index: {}]  }
   0x1   :  { %9 = vsyncpa [#allocation5], 0  ;;  %s106_s9 = smov [#allocation3]   ;;  %s58_s13 = scalar_lea.hbm %s152_s1, 32 }
   0x2   :  { %s18_s10 = sshll.u32 %s106_s9, 4  ;;  %p59_p0 = scmp.ne.s32.totalorder %s152_s1, %s58_s13  ;;  %s19_s10 = int_to_ptr.vmem [resolvable:$true] %s18_s10 }
   0x3   :  { %p62_p1 = scmp.lt.u32.totalorder %s58_s13, %s152_s1 }
   0x5   :  { %p64_p2 = pnand %p62_p1, %p59_p0 }
   0x7   :  { %67 = shalt.err (!%p64_p2)
}
   0x8   :  { %s68_s18 = scalar_lea.vmem %s19_s10, 32  ;;  %p73_p4 = scmp.lt.s32.totalorder %s19_s10, %s19_s10 }
   0x9   :  { %p69_p3 = scmp.ne.s32.totalorder %s19_s10, %s68_s18  ;;  %p74_p5 = scmp.lt.s32.totalorder %s68_s18, %s68_s18 }
   0xb   :  { %p75_p6 = por %p74_p5, %p73_p4 }
   0xd   :  { %p76_p7 = pnand %p75_p6, %p69_p3 }
   0xf   :  { %79 = shalt.err (!%p76_p7)
}
  0x10   :  { %21 = dma.hbm_to_vmem [thread:$0]  %s152_s1, 32, %s19_s10, [#allocation4]  }
  0x11   :  { %102 = dma.done.wait [#allocation4], 32  }
  0x12   :  { %103 = vsyncadd [#allocation4], 4294967264  ;;  %v29_v0 = vstv %s151_s0  ;;  %vm34_vm0 = vcmask 1040384   ;;  %vm35_vm1 = vsmask.f32 256  ;;  %s107_s23 = smov [#allocation6]  }
  0x13   :  { %v27_v1 = vld [vmem:[#allocation3] sm:$0x3]  ;;  %vm36_vm3 = vmand %vm34_vm0, %vm35_vm1  ;;  %s46_s24 = sshll.u32 %s107_s23, 4  ;;  %v37_v2 = vld [vmem:[#allocation6] sm:$0x1]  ;;  %v108_v3 = vmov 0   ;;  %s47_s24 = int_to_ptr.vmem [resolvable:$true] %s46_s24 }
  0x14   :  { %vm30_vm2 = vcmp.ge.f32.partialorder %v27_v1, %v29_v0  ;;  %s80_s1 = scalar_lea.vmem %s47_s24, 16  ;;  %s84_s25 = scalar_lea.vmem %s47_s24, 32 }
  0x15   :  { %vm31_vm4 = vmpackc.low %vm30_vm2, %vm30_vm2  ;;  %p81_p8 = scmp.ne.s32.totalorder %s47_s24, %s80_s1  ;;  %p85_p9 = scmp.lt.s32.totalorder %s47_s24, %s47_s24 }
  0x16   :  { %vm32_vm5 = vmpackc.even %vm31_vm4, %vm31_vm4  ;;  %p86_p10 = scmp.lt.s32.totalorder %s84_s25, %s80_s1 }
  0x17   :  { %v33_v4 = vsel %vm32_vm5, 16843009, %v108_v3 }
  0x18   :  { %v38_v5 = vsel %vm36_vm3, %v33_v4, %v37_v2  ;;  %p87_p11 = por %p86_p10, %p85_p9 }
  0x19   :  { %39 = vst [vmem:[#allocation6] sm:$0x1] %v38_v5 }
  0x1a   :  { %p88_p12 = pnand %p87_p11, %p81_p8 }
  0x1c   :  { %91 = shalt.err (!%p88_p12)
}
  0x1d   :  { %s92_s27 = scalar_lea.hbm %s153_s2, 16 }
  0x1e   :  { %p93_p13 = scmp.ne.s32.totalorder %s153_s2, %s92_s27  ;;  %p96_p0 = scmp.lt.u32.totalorder %s92_s27, %s153_s2 }
  0x20   :  { %p98_p1 = pnand %p96_p0, %p93_p13 }
  0x22   :  { %101 = shalt.err (!%p98_p1)
}
  0x23   :  { %49 = dma.vmem_to_hbm [thread:$0]  %s47_s24, 16, %s153_s2, [#allocation5]  }
  0x24   :  { %104 = dma.done.wait [#allocation5], 16  }
  0x25   :  { %105 = vsyncadd [#allocation5], 4294967280 }
  0x26   :  { %53 = vsyncpa [#allocation4], 1 }
  0x27   :  { %54 = vsyncpa [#allocation5], 1 }

</bundles_post_ra>
